<compile_context>
chip_gen: v5e
topology: v5e:2x2
jax: 0.10.0
libtpu: 0.0.40
codegen_flags: <defaults>
</compile_context>

<pallas_src>
import functools

import jax
import jax.numpy as jnp
from jax.experimental import pallas as pl
from jax.experimental.pallas import tpu as pltpu

_LANE = 128      # lane width: last dim of every block is a multiple of this
_SUBLANE_BF16 = 16  # bf16 packs 16 rows per sublane pair; tile rows in 16s


def _round_up(x, m):
    return ((x + m - 1) // m) * m


def _pad2d(a, rows, cols):
    r, c = a.shape
    if r == rows and c == cols:
        return a
    return jnp.pad(a, ((0, rows - r), (0, cols - c)))


def prepare_mlp_params(w1, b1, w2, b2):
    """One-time (init-time) pad + cast of the MLP parameters.

    Hoisted out of the per-forward path so each call does not re-read /
    re-write the full weight matrices in HBM just to cast them.

    w1: [in_features, hidden_features], b1: [hidden_features]
    w2: [hidden_features, out_features], b2: [out_features]
    Returns (w1_p, b1_p, w2_p, b2_p): zero-padded to lane multiples of 128,
    weights in bf16 (MXU operands), biases in f32 (VPU epilogue).
    """
    IN, HID = w1.shape
    HID2, OUT = w2.shape
    assert HID2 == HID, "w1/w2 hidden dims mismatch"
    IN_p, HID_p, OUT_p = (_round_up(d, _LANE) for d in (IN, HID, OUT))
    w1_p = _pad2d(jnp.asarray(w1, jnp.float32), IN_p, HID_p).astype(jnp.bfloat16)
    w2_p = _pad2d(jnp.asarray(w2, jnp.float32), HID_p, OUT_p).astype(jnp.bfloat16)
    b1_p = _pad2d(jnp.asarray(b1, jnp.float32).reshape(1, HID), 1, HID_p)
    b2_p = _pad2d(jnp.asarray(b2, jnp.float32).reshape(1, OUT), 1, OUT_p)
    return w1_p, b1_p, w2_p, b2_p


def mlp_kernel(x_ref, w1_ref, b1_ref, w2_ref, b2_ref, y_ref, h_ref):
    # x_ref : [TS, IN_p]    f32  hidden-state tile (cast to bf16 here, on VPU)
    # w1_ref: [IN_p, HID_p] bf16 linear1 weight (VMEM-resident across the grid)
    # b1_ref: [1, HID_p]    f32  linear1 bias
    # w2_ref: [HID_p,OUT_p] bf16 linear2 weight (VMEM-resident)
    # b2_ref: [1, OUT_p]    f32  linear2 bias
    # y_ref : [TS, OUT_p]   f32  linear2 output tile (logits)
    # h_ref : [TS, HID_p]   bf16 relu(linear1) output tile (out1)

    # In-kernel cast: reading f32 from HBM and casting on the VPU (hidden under
    # the MXU) avoids a separate XLA cast pass + an extra HBM round trip.
    x = x_ref[...].astype(jnp.bfloat16)

    # linear1: bf16 MXU matmul with f32 accumulation; bias + ReLU in f32
    # (v5e VPU has no bf16 path; epilogue is not the binding slot anyway).
    h = jnp.dot(x, w1_ref[...], preferred_element_type=jnp.float32)
    h = jnp.maximum(h + b1_ref[...], 0.0)

    # bf16 writeback of out1 halves the dominant HBM stream; numerically free
    # since h was computed from bf16 MXU operands. The same bf16 value feeds
    # the second matmul so returned logits match logits recomputed from out1.
    h_bf16 = h.astype(jnp.bfloat16)
    h_ref[...] = h_bf16

    # linear2: bf16 MXU matmul, f32 accumulation, f32 bias + output.
    y = jnp.dot(h_bf16, w2_ref[...], preferred_element_type=jnp.float32)
    y_ref[...] = (y + b2_ref[...]).astype(y_ref.dtype)


@functools.partial(
    jax.jit,
    static_argnames=("hidden_features", "out_features", "token_tile",
                     "single_buffer_weights"),
)
def _mlp_forward_impl(hidden_states, w1_p, b1_p, w2_p, b2_p, *,
                      hidden_features, out_features,
                      token_tile=512, single_buffer_weights=True):
    S, IN = hidden_states.shape
    IN_p, HID_p = w1_p.shape
    OUT_p = w2_p.shape[1]
    if IN > IN_p:
        raise ValueError(f"hidden_states feature dim {IN} > prepared {IN_p}")

    # ---- Token-axis tiling ------------------------------------------------
    # Tiles are multiples of 16 (bf16 sublane packing). Padding of S is
    # minimized: S is rounded to 16, then split into n near-equal tiles, so
    # the dead rows are < 16 * n_tiles (not up to token_tile-1).
    token_tile = max(_SUBLANE_BF16, _round_up(int(token_tile), _SUBLANE_BF16))
    S16 = _round_up(S, _SUBLANE_BF16)
    n_tiles = pl.cdiv(S16, token_tile)
    # v7x has 2 TensorCores: when one big tile would hold >= 512 rows, split it
    # into two even "parallel" tiles so both cores get work (harmless on
    # single-core v5e/v6e — one extra cheap grid step).
    if n_tiles == 1 and S16 >= 512:
        n_tiles = 2
    TS = _round_up(pl.cdiv(S16, n_tiles), _SUBLANE_BF16)
    S_p = n_tiles * TS

    # Zero-pad x (f32, cast happens in-kernel). Padding is exact: padded IN
    # columns multiply zero weight rows; padded S rows produce relu(b1) rows
    # that are sliced off before returning (keep that invariant!).
    x_p = _pad2d(hidden_states, S_p, IN_p)

    # ---- VMEM budget / compiler params ------------------------------------
    w_bufs = 1 if single_buffer_weights else 2
    vmem_bytes = (
        2 * TS * IN_p * 4                 # x tiles, f32, double-buffered
        + w_bufs * IN_p * HID_p * 2       # w1 (bf16, resident)
        + w_bufs * HID_p * OUT_p * 2      # w2 (bf16, resident)
        + w_bufs * (HID_p + OUT_p) * 4    # biases (f32, resident)
        + 2 * TS * HID_p * 2              # h tiles (bf16, double-buffered)
        + 2 * TS * OUT_p * 4              # y tiles (f32, double-buffered)
    )
    # max(requirement, floor): never clamp below the actual need; cap with
    # headroom below the 128 MiB physical VMEM of v5e/v6e (v7x has 64 MiB —
    # the budget above, with single-buffered weights, is what keeps TS legal
    # there; re-derive token_tile per generation for large IN/HID).
    vmem_limit = max(int(vmem_bytes * 1.25) + (2 << 20), 32 << 20)
    vmem_limit = min(vmem_limit, 100 << 20)
    vmem_limit = max(vmem_limit, int(vmem_bytes) + (1 << 20))

    cost = pl.CostEstimate(
        flops=2 * S_p * IN_p * HID_p + 2 * S_p * HID_p * OUT_p,
        transcendentals=0,
        bytes_accessed=(
            S_p * IN_p * 4 + IN_p * HID_p * 2 + HID_p * OUT_p * 2
            + (HID_p + OUT_p) * 4 + S_p * HID_p * 2 + S_p * OUT_p * 4
        ),
    )

    # ---- BlockSpecs --------------------------------------------------------
    # Grid-constant (resident) operands: single-buffer when supported so the
    # pipeliner does not double their VMEM footprint.
    def _resident(shape):
        if single_buffer_weights:
            return pl.BlockSpec(shape, lambda i: (0, 0),
                                pipeline_mode=pl.Buffered(1))
        return pl.BlockSpec(shape, lambda i: (0, 0))

    x_spec = pl.BlockSpec((TS, IN_p), lambda i: (i, 0))
    w1_spec = _resident((IN_p, HID_p))
    b1_spec = _resident((1, HID_p))
    w2_spec = _resident((HID_p, OUT_p))
    b2_spec = _resident((1, OUT_p))
    y_spec = pl.BlockSpec((TS, OUT_p), lambda i: (i, 0))
    h_spec = pl.BlockSpec((TS, HID_p), lambda i: (i, 0))

    y_p, h_p = pl.pallas_call(
        mlp_kernel,
        out_shape=(
            jax.ShapeDtypeStruct((S_p, OUT_p), jnp.float32),   # logits
            jax.ShapeDtypeStruct((S_p, HID_p), jnp.bfloat16),  # out1 (bf16!)
        ),
        grid=(n_tiles,),
        in_specs=[x_spec, w1_spec, b1_spec, w2_spec, b2_spec],
        out_specs=(y_spec, h_spec),
        compiler_params=pltpu.CompilerParams(
            dimension_semantics=("parallel",),   # independent token tiles
            vmem_limit_bytes=vmem_limit,
        ),
        cost_estimate=cost,
    )(x_p, w1_p, b1_p, w2_p, b2_p)

    logits = y_p[:S, :out_features]
    out1 = h_p[:S, :hidden_features]          # bf16 (see kernel comment)
    return logits, out1, hidden_states


# Feature-detect result for pipeline_mode=pl.Buffered(1): None = unknown.
_PIPELINE_MODE_OK = None


def mlp_forward(hidden_states, w1_p, b1_p, w2_p, b2_p, *,
                hidden_features, out_features, token_tile=512):
    """Pallas implementation of MLP.forward on pre-extracted hidden states.

    hidden_states: [seq, in_features] float32 (BERT hidden state after squeeze)
    w1_p/b1_p/w2_p/b2_p: padded params from prepare_mlp_params().
    Returns (logits f32, out1 bf16, hidden_states) matching the module's tuple
    (out1 is bf16 to halve its HBM writeback; cast downstream if f32 is needed).
    """
    global _PIPELINE_MODE_OK
    kwargs = dict(hidden_features=hidden_features, out_features=out_features,
                  token_tile=token_tile)
    if _PIPELINE_MODE_OK is None:
        try:
            out = _mlp_forward_impl(hidden_states, w1_p, b1_p, w2_p, b2_p,
                                    single_buffer_weights=True, **kwargs)
            jax.block_until_ready(out)
            _PIPELINE_MODE_OK = True
            return out
        except Exception:
            # This JAX build rejects pipeline_mode on pallas_call BlockSpecs;
            # fall back to default double-buffered resident weights.
            _PIPELINE_MODE_OK = False
    return _mlp_forward_impl(hidden_states, w1_p, b1_p, w2_p, b2_p,
                             single_buffer_weights=_PIPELINE_MODE_OK, **kwargs)


if __name__ == "__main__":
    # Small shapes consistent with the module: the BERT hidden state (after
    # .squeeze() of a batch-1 output) is [seq, in_features].
    seq = 8
    in_features = 32
    hidden_features = 64
    out_features = 16

    key = jax.random.PRNGKey(0)
    k_x, k_w1, k_b1, k_w2, k_b2 = jax.random.split(key, 5)

    # TODO(synk): bert_model forward (hidden-state extraction) is an external
    # pretrained encoder with no Pallas equivalent; we synthesize its output.
    hidden_states = jax.random.normal(k_x, (seq, in_features), dtype=jnp.float32)

    # Deterministic parameter init (shapes per nn.Linear in __init__).
    w1 = jax.random.normal(k_w1, (in_features, hidden_features), jnp.float32) * 0.05
    b1 = jax.random.normal(k_b1, (hidden_features,), jnp.float32) * 0.05
    w2 = jax.random.normal(k_w2, (hidden_features, out_features), jnp.float32) * 0.05
    b2 = jax.random.normal(k_b2, (out_features,), jnp.float32) * 0.05

    # One-time (init-time) pad + cast of weights, hoisted out of the forward.
    params = prepare_mlp_params(w1, b1, w2, b2)

    logits, out1, inputs_out = mlp_forward(
        hidden_states, *params,
        hidden_features=hidden_features, out_features=out_features)
    jax.block_until_ready((logits, out1, inputs_out))

    # Reference check in plain JAX (f32). bf16 MXU operands / bf16 out1 store
    # => loosened tolerance.
    h_ref = jnp.maximum(hidden_states @ w1 + b1, 0.0)
    y_ref = h_ref @ w2 + b2
    assert logits.shape == (seq, out_features)
    assert out1.shape == (seq, hidden_features)
    assert out1.dtype == jnp.bfloat16
    assert jnp.allclose(out1.astype(jnp.float32), h_ref, atol=5e-2, rtol=5e-2), \
        "out1 mismatch"
    assert jnp.allclose(logits, y_ref, atol=5e-2, rtol=5e-2), "logits mismatch"
    assert jnp.array_equal(inputs_out, hidden_states), "passthrough mismatch"

    print("KERNEL_OK")
</pallas_src>

<mosaic_0001>
module attributes {stable_mosaic.version = 11 : i64} {
  func.func @mlp_kernel(%arg0: i32, %arg1: memref<16x128xf32, #tpu.memory_space<vmem>>, %arg2: memref<128x128xbf16, #tpu.memory_space<vmem>>, %arg3: memref<1x128xf32, #tpu.memory_space<vmem>>, %arg4: memref<128x128xbf16, #tpu.memory_space<vmem>>, %arg5: memref<1x128xf32, #tpu.memory_space<vmem>>, %arg6: memref<16x128xf32, #tpu.memory_space<vmem>>, %arg7: memref<16x128xbf16, #tpu.memory_space<vmem>>) attributes {dimension_semantics = [#tpu.dimension_semantics<parallel>], iteration_bounds = array<i64: 1>, scalar_prefetch = 0 : i64, scratch_operands = 0 : i64, tpu.core_type = #tpu.core_type<tc>, window_params = [{transform_indices = @transform_0, window_bounds = array<i64: 16, 128>}, {pipeline_mode = #tpu.pipeline_mode<synchronous>, transform_indices = @transform_1, window_bounds = array<i64: 128, 128>}, {pipeline_mode = #tpu.pipeline_mode<synchronous>, transform_indices = @transform_2, window_bounds = array<i64: 1, 128>}, {pipeline_mode = #tpu.pipeline_mode<synchronous>, transform_indices = @transform_3, window_bounds = array<i64: 128, 128>}, {pipeline_mode = #tpu.pipeline_mode<synchronous>, transform_indices = @transform_4, window_bounds = array<i64: 1, 128>}, {transform_indices = @transform_5, window_bounds = array<i64: 16, 128>}, {transform_indices = @transform_6, window_bounds = array<i64: 16, 128>}]} {
    %c0 = arith.constant 0 : index
    %c0_0 = arith.constant 0 : index
    %0 = vector.load %arg1[%c0, %c0_0] : memref<16x128xf32, #tpu.memory_space<vmem>>, vector<16x128xf32>
    %1 = arith.truncf %0 : vector<16x128xf32> to vector<16x128xbf16>
    %c0_1 = arith.constant 0 : index
    %c0_2 = arith.constant 0 : index
    %2 = vector.load %arg2[%c0_1, %c0_2] : memref<128x128xbf16, #tpu.memory_space<vmem>>, vector<128x128xbf16>
    %cst = arith.constant dense<0.000000e+00> : vector<16x128xf32>
    %3 = tpu.matmul %1, %2, %cst {dimension_numbers = #tpu.dot_dimension_numbers<[1], [0], [0], [1], [0, 0, 1, 1], [], []>} : vector<16x128xbf16>, vector<128x128xbf16>, vector<16x128xf32> -> vector<16x128xf32>
    %c0_3 = arith.constant 0 : index
    %c0_4 = arith.constant 0 : index
    %4 = vector.load %arg3[%c0_3, %c0_4] : memref<1x128xf32, #tpu.memory_space<vmem>>, vector<1x128xf32>
    %5 = vector.broadcast %4 : vector<1x128xf32> to vector<16x128xf32>
    %6 = arith.addf %3, %5 : vector<16x128xf32>
    %cst_5 = arith.constant 0.000000e+00 : f32
    %7 = vector.broadcast %cst_5 : f32 to vector<16x128xf32>
    %8 = arith.maximumf %6, %7 : vector<16x128xf32>
    %9 = arith.truncf %8 : vector<16x128xf32> to vector<16x128xbf16>
    %c0_6 = arith.constant 0 : index
    %c0_7 = arith.constant 0 : index
    %10 = vector.load %arg7[%c0_6, %c0_7] : memref<16x128xbf16, #tpu.memory_space<vmem>>, vector<16x128xbf16>
    tpu.vector_store %arg7[%c0_6, %c0_7], %9 {strides = array<i32>} : memref<16x128xbf16, #tpu.memory_space<vmem>>, vector<16x128xbf16>,
    %c0_8 = arith.constant 0 : index
    %c0_9 = arith.constant 0 : index
    %11 = vector.load %arg4[%c0_8, %c0_9] : memref<128x128xbf16, #tpu.memory_space<vmem>>, vector<128x128xbf16>
    %cst_10 = arith.constant dense<0.000000e+00> : vector<16x128xf32>
    %12 = tpu.matmul %9, %11, %cst_10 {dimension_numbers = #tpu.dot_dimension_numbers<[1], [0], [0], [1], [0, 0, 1, 1], [], []>} : vector<16x128xbf16>, vector<128x128xbf16>, vector<16x128xf32> -> vector<16x128xf32>
    %c0_11 = arith.constant 0 : index
    %c0_12 = arith.constant 0 : index
    %13 = vector.load %arg5[%c0_11, %c0_12] : memref<1x128xf32, #tpu.memory_space<vmem>>, vector<1x128xf32>
    %14 = vector.broadcast %13 : vector<1x128xf32> to vector<16x128xf32>
    %15 = arith.addf %12, %14 : vector<16x128xf32>
    %c0_13 = arith.constant 0 : index
    %c0_14 = arith.constant 0 : index
    %16 = vector.load %arg6[%c0_13, %c0_14] : memref<16x128xf32, #tpu.memory_space<vmem>>, vector<16x128xf32>
    tpu.vector_store %arg6[%c0_13, %c0_14], %15 {strides = array<i32>} : memref<16x128xf32, #tpu.memory_space<vmem>>, vector<16x128xf32>,
    return
  }
  func.func @transform_0(%arg0: i32) -> (i32, i32) {
    %c0_i32 = arith.constant 0 : i32
    %c0_i32_0 = arith.constant 0 : i32
    return %arg0, %c0_i32 : i32, i32
  }
  func.func @transform_1(%arg0: i32) -> (i32, i32) {
    %c0_i32 = arith.constant 0 : i32
    %c0_i32_0 = arith.constant 0 : i32
    %c0_i32_1 = arith.constant 0 : i32
    return %c0_i32, %c0_i32_0 : i32, i32
  }
  func.func @transform_2(%arg0: i32) -> (i32, i32) {
    %c0_i32 = arith.constant 0 : i32
    %c0_i32_0 = arith.constant 0 : i32
    %c0_i32_1 = arith.constant 0 : i32
    return %c0_i32, %c0_i32_0 : i32, i32
  }
  func.func @transform_3(%arg0: i32) -> (i32, i32) {
    %c0_i32 = arith.constant 0 : i32
    %c0_i32_0 = arith.constant 0 : i32
    %c0_i32_1 = arith.constant 0 : i32
    return %c0_i32, %c0_i32_0 : i32, i32
  }
  func.func @transform_4(%arg0: i32) -> (i32, i32) {
    %c0_i32 = arith.constant 0 : i32
    %c0_i32_0 = arith.constant 0 : i32
    %c0_i32_1 = arith.constant 0 : i32
    return %c0_i32, %c0_i32_0 : i32, i32
  }
  func.func @transform_5(%arg0: i32) -> (i32, i32) {
    %c0_i32 = arith.constant 0 : i32
    %c0_i32_0 = arith.constant 0 : i32
    return %arg0, %c0_i32 : i32, i32
  }
  func.func @transform_6(%arg0: i32) -> (i32, i32) {
    %c0_i32 = arith.constant 0 : i32
    %c0_i32_0 = arith.constant 0 : i32
    return %arg0, %c0_i32 : i32, i32
  }
}

module attributes {stable_mosaic.version = 11 : i64} {
  func.func @mlp_kernel(%arg0: i32, %arg1: memref<16x128xf32, #tpu.memory_space<vmem>>, %arg2: memref<128x128xbf16, #tpu.memory_space<vmem>>, %arg3: memref<1x128xf32, #tpu.memory_space<vmem>>, %arg4: memref<128x128xbf16, #tpu.memory_space<vmem>>, %arg5: memref<1x128xf32, #tpu.memory_space<vmem>>, %arg6: memref<16x128xf32, #tpu.memory_space<vmem>>, %arg7: memref<16x128xbf16, #tpu.memory_space<vmem>>) attributes {dimension_semantics = [#tpu.dimension_semantics<parallel>], iteration_bounds = array<i64: 1>, scalar_prefetch = 0 : i64, scratch_operands = 0 : i64, tpu.core_type = #tpu.core_type<tc>, window_params = [{transform_indices = @transform_0, window_bounds = array<i64: 16, 128>}, {pipeline_mode = #tpu.pipeline_mode<synchronous>, transform_indices = @transform_1, window_bounds = array<i64: 128, 128>}, {pipeline_mode = #tpu.pipeline_mode<synchronous>, transform_indices = @transform_2, window_bounds = array<i64: 1, 128>}, {pipeline_mode = #tpu.pipeline_mode<synchronous>, transform_indices = @transform_3, window_bounds = array<i64: 128, 128>}, {pipeline_mode = #tpu.pipeline_mode<synchronous>, transform_indices = @transform_4, window_bounds = array<i64: 1, 128>}, {transform_indices = @transform_5, window_bounds = array<i64: 16, 128>}, {transform_indices = @transform_6, window_bounds = array<i64: 16, 128>}]} {
    %c0 = arith.constant 0 : index
    %c0_0 = arith.constant 0 : index
    %0 = vector.load %arg1[%c0, %c0_0] : memref<16x128xf32, #tpu.memory_space<vmem>>, vector<16x128xf32>
    %1 = arith.truncf %0 : vector<16x128xf32> to vector<16x128xbf16>
    %c0_1 = arith.constant 0 : index
    %c0_2 = arith.constant 0 : index
    %2 = vector.load %arg2[%c0_1, %c0_2] : memref<128x128xbf16, #tpu.memory_space<vmem>>, vector<128x128xbf16>
    %cst = arith.constant dense<0.000000e+00> : vector<16x128xf32>
    %3 = tpu.matmul %1, %2, %cst {dimension_numbers = #tpu.dot_dimension_numbers<[1], [0], [0], [1], [0, 0, 1, 1], [], []>} : vector<16x128xbf16>, vector<128x128xbf16>, vector<16x128xf32> -> vector<16x128xf32>
    %c0_3 = arith.constant 0 : index
    %c0_4 = arith.constant 0 : index
    %4 = vector.load %arg3[%c0_3, %c0_4] : memref<1x128xf32, #tpu.memory_space<vmem>>, vector<1x128xf32>
    %5 = vector.broadcast %4 : vector<1x128xf32> to vector<16x128xf32>
    %6 = arith.addf %3, %5 : vector<16x128xf32>
    %cst_5 = arith.constant 0.000000e+00 : f32
    %7 = vector.broadcast %cst_5 : f32 to vector<16x128xf32>
    %8 = arith.maximumf %6, %7 : vector<16x128xf32>
    %9 = arith.truncf %8 : vector<16x128xf32> to vector<16x128xbf16>
    %c0_6 = arith.constant 0 : index
    %c0_7 = arith.constant 0 : index
    %10 = vector.load %arg7[%c0_6, %c0_7] : memref<16x128xbf16, #tpu.memory_space<vmem>>, vector<16x128xbf16>
    tpu.vector_store %arg7[%c0_6, %c0_7], %9 {strides = array<i32>} : memref<16x128xbf16, #tpu.memory_space<vmem>>, vector<16x128xbf16>,
    %c0_8 = arith.constant 0 : index
    %c0_9 = arith.constant 0 : index
    %11 = vector.load %arg4[%c0_8, %c0_9] : memref<128x128xbf16, #tpu.memory_space<vmem>>, vector<128x128xbf16>
    %cst_10 = arith.constant dense<0.000000e+00> : vector<16x128xf32>
    %12 = tpu.matmul %9, %11, %cst_10 {dimension_numbers = #tpu.dot_dimension_numbers<[1], [0], [0], [1], [0, 0, 1, 1], [], []>} : vector<16x128xbf16>, vector<128x128xbf16>, vector<16x128xf32> -> vector<16x128xf32>
    %c0_11 = arith.constant 0 : index
    %c0_12 = arith.constant 0 : index
    %13 = vector.load %arg5[%c0_11, %c0_12] : memref<1x128xf32, #tpu.memory_space<vmem>>, vector<1x128xf32>
    %14 = vector.broadcast %13 : vector<1x128xf32> to vector<16x128xf32>
    %15 = arith.addf %12, %14 : vector<16x128xf32>
    %c0_13 = arith.constant 0 : index
    %c0_14 = arith.constant 0 : index
    %16 = vector.load %arg6[%c0_13, %c0_14] : memref<16x128xf32, #tpu.memory_space<vmem>>, vector<16x128xf32>
    tpu.vector_store %arg6[%c0_13, %c0_14], %15 {strides = array<i32>} : memref<16x128xf32, #tpu.memory_space<vmem>>, vector<16x128xf32>,
    return
  }
  func.func @transform_0(%arg0: i32) -> (i32, i32) {
    %c0_i32 = arith.constant 0 : i32
    %c0_i32_0 = arith.constant 0 : i32
    return %arg0, %c0_i32 : i32, i32
  }
  func.func @transform_1(%arg0: i32) -> (i32, i32) {
    %c0_i32 = arith.constant 0 : i32
    %c0_i32_0 = arith.constant 0 : i32
    %c0_i32_1 = arith.constant 0 : i32
    return %c0_i32, %c0_i32_0 : i32, i32
  }
  func.func @transform_2(%arg0: i32) -> (i32, i32) {
    %c0_i32 = arith.constant 0 : i32
    %c0_i32_0 = arith.constant 0 : i32
    %c0_i32_1 = arith.constant 0 : i32
    return %c0_i32, %c0_i32_0 : i32, i32
  }
  func.func @transform_3(%arg0: i32) -> (i32, i32) {
    %c0_i32 = arith.constant 0 : i32
    %c0_i32_0 = arith.constant 0 : i32
    %c0_i32_1 = arith.constant 0 : i32
    return %c0_i32, %c0_i32_0 : i32, i32
  }
  func.func @transform_4(%arg0: i32) -> (i32, i32) {
    %c0_i32 = arith.constant 0 : i32
    %c0_i32_0 = arith.constant 0 : i32
    %c0_i32_1 = arith.constant 0 : i32
    return %c0_i32, %c0_i32_0 : i32, i32
  }
  func.func @transform_5(%arg0: i32) -> (i32, i32) {
    %c0_i32 = arith.constant 0 : i32
    %c0_i32_0 = arith.constant 0 : i32
    return %arg0, %c0_i32 : i32, i32
  }
  func.func @transform_6(%arg0: i32) -> (i32, i32) {
    %c0_i32 = arith.constant 0 : i32
    %c0_i32_0 = arith.constant 0 : i32
    return %arg0, %c0_i32 : i32, i32
  }
}

</mosaic_0001>

<bundles_post_ra>
// kernel: _mlp_forward_impl.1
= control target key start
LH: loop header
LB: loop body
LE: loop exit
PB: predicated region body
PF: predicated region fallthrough
CT: control target
= control target key end

     0   :  { %12 = vsyncpa [#allocation3], 0  ;;  %s454_s0 = inlined_call_operand.vmem [shape: f32[16,128], index: 0, kind: input, shape index: {}]   ;;  %s455_s1 = inlined_call_operand.hbm [shape: bf16[128,128], index: 1, kind: input, shape index: {}]   ;;  %s456_s2 = inlined_call_operand.vmem [shape: f32[1,128], index: 2, kind: input, shape index: {}]   ;;  %s457_s3 = inlined_call_operand.hbm [shape: bf16[128,128], index: 3, kind: input, shape index: {}]   ;;  %s458_s4 = inlined_call_operand.vmem [shape: f32[1,128], index: 4, kind: input, shape index: {}]   ;;  %s459_s5 = inlined_call_operand.vmem [shape: f32[16,128], index: 5, kind: output, shape index: {0}]   ;;  %s460_s6 = inlined_call_operand.vmem [shape: bf16[16,128], index: 6, kind: output, shape index: {1}]  }
   0x1   :  { %s20_s23 = sshll.u32 %s455_s1, 4  ;;  %s21_s23 = int_to_ptr.hbm [resolvable:$true] %s20_s23 }
   0x2   :  { %13 = vsyncpa [#allocation5], 0  ;;  %s388_s24 = smov [#allocation2]   ;;  %s35_s28 = sshll.u32 %s457_s3, 4  ;;  %s36_s28 = int_to_ptr.hbm [resolvable:$true] %s35_s28 }
   0x3   :  { %s22_s25 = sshll.u32 %s388_s24, 4  ;;  %s389_s29 = smov 64   ;;  %s23_s25 = int_to_ptr.vmem [resolvable:$true] %s22_s25 }
   0x4   :  { %s390_s30 = smov 4   ;;  %s391_s7 = smov [#allocation4]  }
   0x5   :  { %28 = dma.hbm_to_vmem [thread:$0]  %s21_s23, 1024, %s23_s25, [#allocation3], %s389_s29, %s389_s29, %s390_s30  }
   0x6   :  { %s37_s8 = sshll.u32 %s391_s7, 4  ;;  %s38_s8 = int_to_ptr.vmem [resolvable:$true] %s37_s8 }
   0x7   :  { %43 = dma.hbm_to_vmem [thread:$0]  %s36_s28, 1024, %s38_s8, [#allocation5], %s389_s29, %s389_s29, %s390_s30  }
   0x8   :  { %384 = dma.done.wait [#allocation3], 1024  }
   0x9   :  { %385 = vsyncadd [#allocation3], 4294966272 }
   0xa   :  { %386 = dma.done.wait [#allocation5], 1024  }
   0xb   :  { %387 = vsyncadd [#allocation5], 4294966272  ;;  %v316_v0 = vld [vmem:[#allocation2 + $0x38] sm:$0xff]  ;;  %v315_v1 = vld [vmem:[#allocation2 + $0x30] sm:$0xff] }
   0xc   :  { %125 = vmatpush.bf16.msra.mxu0 %v316_v0  ;;  %v324_v2 = vld [vmem:[#allocation4 + $0x38] sm:$0xff]  ;;  %v323_v3 = vld [vmem:[#allocation4 + $0x30] sm:$0xff]  ;;  %v314_v4 = vld [vmem:[#allocation2 + $0x28] sm:$0xff] }
   0xd   :  { %219 = vmatpush.bf16.msra.mxu1 %v324_v2  ;;  %v322_v5 = vld [vmem:[#allocation4 + $0x28] sm:$0xff]  ;;  %v313_v6 = vld [vmem:[#allocation2 + $0x20] sm:$0xff]  ;;  %v312_v7 = vld [vmem:[#allocation2 + $0x18] sm:$0xff] }
   0xe   :  { %v311_v8 = vld [vmem:[#allocation2 + $0x10] sm:$0xff]  ;;  %v310_v9 = vld [vmem:[#allocation2 + $0x8] sm:$0xff]  ;;  %v309_v10 = vld [vmem:[#allocation2] sm:$0xff] }
   0xf   :  { %v54_v11 = vld [vmem:[%s454_s0] sm:$0xff]  ;;  %v55_v12 = vld [vmem:[%s454_s0 + $0x8] sm:$0xff]  ;;  %v320_v15 = vld [vmem:[#allocation4 + $0x18] sm:$0xff] }
  0x10   :  { %126 = vmatpush.bf16.msra.mxu0 %v315_v1  ;;  %v56_v13 = vpack.c.bf16 %v55_v12, %v54_v11  ;;  %v321_v14 = vld [vmem:[#allocation4 + $0x20] sm:$0xff]  ;;  %v319_v16 = vld [vmem:[#allocation4 + $0x10] sm:$0xff]  ;;  %v318_v17 = vld [vmem:[#allocation4 + $0x8] sm:$0xff] }
  0x11   :  { %220 = vmatpush.bf16.msra.mxu1 %v323_v3  ;;  %v317_v18 = vld [vmem:[#allocation4] sm:$0xff] }
  0x12   :  { %v334_v19 = vld [vmem:[%s456_s2] ss:$0 sm:$0xff] }
  0x13   :  { %v335_v32 = vld [vmem:[%s458_s4] ss:$0 sm:$0xff] }
  0x14   :  { %127 = vmatpush.bf16.msra.mxu0 %v314_v4 }
  0x15   :  { %221 = vmatpush.bf16.msra.mxu1 %v322_v5 }
  0x18   :  { %128 = vmatpush.bf16.msra.mxu0 %v313_v6 }
  0x19   :  { %222 = vmatpush.bf16.msra.mxu1 %v321_v14 }
  0x1c   :  { %129 = vmatpush.bf16.msra.mxu0 %v312_v7 }
  0x1d   :  { %223 = vmatpush.bf16.msra.mxu1 %v320_v15 }
  0x20   :  { %130 = vmatpush.bf16.msra.mxu0 %v311_v8 }
  0x21   :  { %224 = vmatpush.bf16.msra.mxu1 %v319_v16 }
  0x24   :  { %131 = vmatpush.bf16.msra.mxu0 %v310_v9 }
  0x25   :  { %225 = vmatpush.bf16.msra.mxu1 %v318_v17 }
  0x28   :  { %132 = vmatpush.bf16.msra.mxu0 %v309_v10 }
  0x29   :  { %226 = vmatpush.bf16.msra.mxu1 %v317_v18 }
  0x2b   :  { %133 = vmatmul.bf16.vlgmr.msra.gmra.mxu0 %v56_v13 }
  0xa8   :  { %v134_v20 = vpop.f32.mrf.mxu0 }
  0xa9   :  { %v135_v21 = vadd.f32 %v334_v19, %v134_v20 }
  0xab   :  { %v139_v22 = vmax.f32 %v135_v21, 0.0 }
  0xad   :  { %v141_v25 = vpack.c.bf16 %v139_v22, %v139_v22 }
  0xaf   :  { %v167_v29 = vunpack.c.l.b16 %v141_v25 }
  0xb0   :  { %v136_v23 = vpop.f32.mrf.mxu0 }
  0xb1   :  { %v137_v24 = vadd.f32 %v334_v19, %v136_v23 }
  0xb3   :  { %v140_v26 = vmax.f32 %v137_v24, 0.0 }
  0xb5   :  { %v142_v27 = vpack.c.bf16 %v140_v26, %v140_v26  ;;  %v328_v28 = vpack.c.bf16 %v140_v26, %v139_v22 }
  0xb7   :  { %329 = vst [vmem:[%s460_s6] sm:$0xff] %v328_v28   ;;  %v168_v30 = vunpack.c.l.b16 %v142_v27 }
  0xb9   :  { %v169_v31 = vpack.c.b16 %v168_v30, %v167_v29 }
  0xbb   :  { %227 = vmatmul.bf16.vlgmr.msra.gmra.mxu1 %v169_v31 }
 0x138   :  { %v228_v33 = vpop.f32.mrf.mxu1 }
 0x139   :  { %v229_v34 = vadd.f32 %v335_v32, %v228_v33 }
 0x13b   :  { %233 = vst [vmem:[%s459_s5] sm:$0xff] %v229_v34 }
 0x140   :  { %v230_v35 = vpop.f32.mrf.mxu1 }
 0x141   :  { %v231_v36 = vadd.f32 %v335_v32, %v230_v35 }
 0x143   :  { %234 = vst [vmem:[%s459_s5 + $0x8] sm:$0xff] %v231_v36 }
 0x144   :  { %243 = vsyncpa [#allocation3], 1 }
 0x145   :  { %244 = vsyncpa [#allocation5], 1 }

// kernel: _mlp_forward_impl.1
= control target key start
LH: loop header
LB: loop body
LE: loop exit
PB: predicated region body
PF: predicated region fallthrough
CT: control target
= control target key end

     0   :  { %12 = vsyncpa [#allocation3], 0  ;;  %s454_s0 = inlined_call_operand.vmem [shape: f32[16,128], index: 0, kind: input, shape index: {}]   ;;  %s455_s1 = inlined_call_operand.hbm [shape: bf16[128,128], index: 1, kind: input, shape index: {}]   ;;  %s456_s2 = inlined_call_operand.vmem [shape: f32[1,128], index: 2, kind: input, shape index: {}]   ;;  %s457_s3 = inlined_call_operand.hbm [shape: bf16[128,128], index: 3, kind: input, shape index: {}]   ;;  %s458_s4 = inlined_call_operand.vmem [shape: f32[1,128], index: 4, kind: input, shape index: {}]   ;;  %s459_s5 = inlined_call_operand.vmem [shape: f32[16,128], index: 5, kind: output, shape index: {0}]   ;;  %s460_s6 = inlined_call_operand.vmem [shape: bf16[16,128], index: 6, kind: output, shape index: {1}]  }
   0x1   :  { %s20_s23 = sshll.u32 %s455_s1, 4  ;;  %s21_s23 = int_to_ptr.hbm [resolvable:$true] %s20_s23 }
   0x2   :  { %13 = vsyncpa [#allocation5], 0  ;;  %s388_s24 = smov [#allocation2]   ;;  %s35_s28 = sshll.u32 %s457_s3, 4  ;;  %s36_s28 = int_to_ptr.hbm [resolvable:$true] %s35_s28 }
   0x3   :  { %s22_s25 = sshll.u32 %s388_s24, 4  ;;  %s389_s29 = smov 64   ;;  %s23_s25 = int_to_ptr.vmem [resolvable:$true] %s22_s25 }
   0x4   :  { %s390_s30 = smov 4   ;;  %s391_s7 = smov [#allocation4]  }
   0x5   :  { %28 = dma.hbm_to_vmem [thread:$0]  %s21_s23, 1024, %s23_s25, [#allocation3], %s389_s29, %s389_s29, %s390_s30  }
   0x6   :  { %s37_s8 = sshll.u32 %s391_s7, 4  ;;  %s38_s8 = int_to_ptr.vmem [resolvable:$true] %s37_s8 }
   0x7   :  { %43 = dma.hbm_to_vmem [thread:$0]  %s36_s28, 1024, %s38_s8, [#allocation5], %s389_s29, %s389_s29, %s390_s30  }
   0x8   :  { %384 = dma.done.wait [#allocation3], 1024  }
   0x9   :  { %385 = vsyncadd [#allocation3], 4294966272 }
   0xa   :  { %386 = dma.done.wait [#allocation5], 1024  }
   0xb   :  { %387 = vsyncadd [#allocation5], 4294966272  ;;  %v316_v0 = vld [vmem:[#allocation2 + $0x38] sm:$0xff]  ;;  %v315_v1 = vld [vmem:[#allocation2 + $0x30] sm:$0xff] }
   0xc   :  { %125 = vmatpush.bf16.msra.mxu0 %v316_v0  ;;  %v324_v2 = vld [vmem:[#allocation4 + $0x38] sm:$0xff]  ;;  %v323_v3 = vld [vmem:[#allocation4 + $0x30] sm:$0xff]  ;;  %v314_v4 = vld [vmem:[#allocation2 + $0x28] sm:$0xff] }
   0xd   :  { %219 = vmatpush.bf16.msra.mxu1 %v324_v2  ;;  %v322_v5 = vld [vmem:[#allocation4 + $0x28] sm:$0xff]  ;;  %v313_v6 = vld [vmem:[#allocation2 + $0x20] sm:$0xff]  ;;  %v312_v7 = vld [vmem:[#allocation2 + $0x18] sm:$0xff] }
   0xe   :  { %v311_v8 = vld [vmem:[#allocation2 + $0x10] sm:$0xff]  ;;  %v310_v9 = vld [vmem:[#allocation2 + $0x8] sm:$0xff]  ;;  %v309_v10 = vld [vmem:[#allocation2] sm:$0xff] }
   0xf   :  { %v54_v11 = vld [vmem:[%s454_s0] sm:$0xff]  ;;  %v55_v12 = vld [vmem:[%s454_s0 + $0x8] sm:$0xff]  ;;  %v320_v15 = vld [vmem:[#allocation4 + $0x18] sm:$0xff] }
  0x10   :  { %126 = vmatpush.bf16.msra.mxu0 %v315_v1  ;;  %v56_v13 = vpack.c.bf16 %v55_v12, %v54_v11  ;;  %v321_v14 = vld [vmem:[#allocation4 + $0x20] sm:$0xff]  ;;  %v319_v16 = vld [vmem:[#allocation4 + $0x10] sm:$0xff]  ;;  %v318_v17 = vld [vmem:[#allocation4 + $0x8] sm:$0xff] }
  0x11   :  { %220 = vmatpush.bf16.msra.mxu1 %v323_v3  ;;  %v317_v18 = vld [vmem:[#allocation4] sm:$0xff] }
  0x12   :  { %v334_v19 = vld [vmem:[%s456_s2] ss:$0 sm:$0xff] }
  0x13   :  { %v335_v32 = vld [vmem:[%s458_s4] ss:$0 sm:$0xff] }
  0x14   :  { %127 = vmatpush.bf16.msra.mxu0 %v314_v4 }
  0x15   :  { %221 = vmatpush.bf16.msra.mxu1 %v322_v5 }
  0x18   :  { %128 = vmatpush.bf16.msra.mxu0 %v313_v6 }
  0x19   :  { %222 = vmatpush.bf16.msra.mxu1 %v321_v14 }
  0x1c   :  { %129 = vmatpush.bf16.msra.mxu0 %v312_v7 }
  0x1d   :  { %223 = vmatpush.bf16.msra.mxu1 %v320_v15 }
  0x20   :  { %130 = vmatpush.bf16.msra.mxu0 %v311_v8 }
  0x21   :  { %224 = vmatpush.bf16.msra.mxu1 %v319_v16 }
  0x24   :  { %131 = vmatpush.bf16.msra.mxu0 %v310_v9 }
  0x25   :  { %225 = vmatpush.bf16.msra.mxu1 %v318_v17 }
  0x28   :  { %132 = vmatpush.bf16.msra.mxu0 %v309_v10 }
  0x29   :  { %226 = vmatpush.bf16.msra.mxu1 %v317_v18 }
  0x2b   :  { %133 = vmatmul.bf16.vlgmr.msra.gmra.mxu0 %v56_v13 }
  0xa8   :  { %v134_v20 = vpop.f32.mrf.mxu0 }
  0xa9   :  { %v135_v21 = vadd.f32 %v334_v19, %v134_v20 }
  0xab   :  { %v139_v22 = vmax.f32 %v135_v21, 0.0 }
  0xad   :  { %v141_v25 = vpack.c.bf16 %v139_v22, %v139_v22 }
  0xaf   :  { %v167_v29 = vunpack.c.l.b16 %v141_v25 }
  0xb0   :  { %v136_v23 = vpop.f32.mrf.mxu0 }
  0xb1   :  { %v137_v24 = vadd.f32 %v334_v19, %v136_v23 }
  0xb3   :  { %v140_v26 = vmax.f32 %v137_v24, 0.0 }
  0xb5   :  { %v142_v27 = vpack.c.bf16 %v140_v26, %v140_v26  ;;  %v328_v28 = vpack.c.bf16 %v140_v26, %v139_v22 }
  0xb7   :  { %329 = vst [vmem:[%s460_s6] sm:$0xff] %v328_v28   ;;  %v168_v30 = vunpack.c.l.b16 %v142_v27 }
  0xb9   :  { %v169_v31 = vpack.c.b16 %v168_v30, %v167_v29 }
  0xbb   :  { %227 = vmatmul.bf16.vlgmr.msra.gmra.mxu1 %v169_v31 }
 0x138   :  { %v228_v33 = vpop.f32.mrf.mxu1 }
 0x139   :  { %v229_v34 = vadd.f32 %v335_v32, %v228_v33 }
 0x13b   :  { %233 = vst [vmem:[%s459_s5] sm:$0xff] %v229_v34 }
 0x140   :  { %v230_v35 = vpop.f32.mrf.mxu1 }
 0x141   :  { %v231_v36 = vadd.f32 %v335_v32, %v230_v35 }
 0x143   :  { %234 = vst [vmem:[%s459_s5 + $0x8] sm:$0xff] %v231_v36 }
 0x144   :  { %243 = vsyncpa [#allocation3], 1 }
 0x145   :  { %244 = vsyncpa [#allocation5], 1 }

</bundles_post_ra>
